<compile_context>
chip_gen: v6e
topology: v6e:2x2x1
jax: 0.10.0
libtpu: 0.0.40
codegen_flags: <defaults>
</compile_context>

<pallas_src>
import jax
import jax.numpy as jnp
from jax.experimental import pallas as pl
from jax.experimental.pallas import tpu as pltpu

IN_FEATURES = 1000
NUM_CLASSES = 10          # args.num_classes (small, deterministic choice)

TM_MAX = 2048             # max batch-tile rows (double-buffered x ~15.6 MiB f32)


def _round_up(x, m):
    return ((x + m - 1) // m) * m


def _pick_tile(B):
    """Batch-tile rows: multiple of 8, <= TM_MAX, >= 2 grid steps when B > 8."""
    b_pad = _round_up(max(B, 1), 8)
    if b_pad <= 8:
        return 8
    tm = _round_up(pl.cdiv(B, 2), 8)     # aim for >= 2 steps (v7x megacore)
    return max(8, min(TM_MAX, tm, b_pad))


def _linear_kernel(x_ref, w_ref, b_ref, o_ref):
    # One batch tile: (tm, K) @ (K, C) + (1, C) on the MXU, f32 accumulation.
    acc = jnp.dot(x_ref[...], w_ref[...], preferred_element_type=jnp.float32)
    o_ref[...] = (acc + b_ref[...]).astype(o_ref.dtype)


@jax.jit
def baseline_forward(x, w, b):
    """x: (B, 1000) f32, w: (1000, C) f32, b: (1, C) f32 -> (B, C) f32."""
    B, K = x.shape
    C = w.shape[1]

    tm = _pick_tile(B)
    grid = (pl.cdiv(B, tm),)

    return pl.pallas_call(
        _linear_kernel,
        out_shape=jax.ShapeDtypeStruct((B, C), jnp.float32),
        grid=grid,
        in_specs=[
            pl.BlockSpec((tm, K), lambda i: (i, 0)),   # streamed x tiles (full K)
            pl.BlockSpec((K, C), lambda i: (0, 0)),    # resident weights (full block)
            pl.BlockSpec((1, C), lambda i: (0, 0)),    # resident bias
        ],
        out_specs=pl.BlockSpec((tm, C), lambda i: (i, 0)),
        compiler_params=pltpu.CompilerParams(
            dimension_semantics=("parallel",),   # megacore-shard batch tiles (v7x)
            vmem_limit_bytes=32 << 20,           # big tiles also fit v5e's scoped VMEM
        ),
        cost_estimate=pl.CostEstimate(
            flops=2 * B * K * C,
            transcendentals=0,
            bytes_accessed=(B * K + K * C + C + B * C) * 4,
        ),
    )(x, w, b)


def init_params(key, in_features=IN_FEATURES, num_classes=NUM_CLASSES):
    # Deterministic init mimicking PyTorch nn.Linear default:
    # U(-1/sqrt(fan_in), 1/sqrt(fan_in)) for both weight and bias.
    kw, kb = jax.random.split(key)
    bound = 1.0 / jnp.sqrt(jnp.float32(in_features))
    # PyTorch weight is (out, in); store transposed (in, out) for x @ W.
    w = jax.random.uniform(kw, (in_features, num_classes), jnp.float32,
                           minval=-bound, maxval=bound)
    b = jax.random.uniform(kb, (1, num_classes), jnp.float32,
                           minval=-bound, maxval=bound)
    return w, b


if __name__ == "__main__":
    key = jax.random.PRNGKey(0)
    k_x, k_p = jax.random.split(key)

    B = 8
    x = jax.random.normal(k_x, (B, IN_FEATURES), jnp.float32)
    w, b = init_params(k_p)

    out = baseline_forward(x, w, b)
    jax.block_until_ready(out)

    # Sanity check against plain JAX reference (f32 path -> tight tolerance).
    ref = x @ w + b
    assert out.shape == (B, NUM_CLASSES)
    assert jnp.allclose(out, ref, atol=1e-4, rtol=1e-4)

    print("KERNEL_OK")
</pallas_src>

<mosaic_0001>
module attributes {stable_mosaic.version = 11 : i64} {
  func.func @_linear_kernel(%arg0: i32, %arg1: memref<8x1000xf32, #tpu.memory_space<vmem>>, %arg2: memref<1000x10xf32, #tpu.memory_space<vmem>>, %arg3: memref<1x10xf32, #tpu.memory_space<vmem>>, %arg4: memref<8x10xf32, #tpu.memory_space<vmem>>) attributes {dimension_semantics = [#tpu.dimension_semantics<parallel>], iteration_bounds = array<i64: 1>, scalar_prefetch = 0 : i64, scratch_operands = 0 : i64, tpu.core_type = #tpu.core_type<tc>, window_params = [{transform_indices = @transform_0, window_bounds = array<i64: 8, 1000>}, {pipeline_mode = #tpu.pipeline_mode<synchronous>, transform_indices = @transform_1, window_bounds = array<i64: 1000, 10>}, {pipeline_mode = #tpu.pipeline_mode<synchronous>, transform_indices = @transform_2, window_bounds = array<i64: 1, 10>}, {transform_indices = @transform_3, window_bounds = array<i64: 8, 10>}]} {
    %c0 = arith.constant 0 : index
    %c0_0 = arith.constant 0 : index
    %0 = vector.load %arg1[%c0, %c0_0] : memref<8x1000xf32, #tpu.memory_space<vmem>>, vector<8x1000xf32>
    %c0_1 = arith.constant 0 : index
    %c0_2 = arith.constant 0 : index
    %1 = vector.load %arg2[%c0_1, %c0_2] : memref<1000x10xf32, #tpu.memory_space<vmem>>, vector<1000x10xf32>
    %cst = arith.constant dense<0.000000e+00> : vector<8x10xf32>
    %2 = tpu.matmul %0, %1, %cst {dimension_numbers = #tpu.dot_dimension_numbers<[1], [0], [0], [1], [0, 0, 1, 1], [], []>} : vector<8x1000xf32>, vector<1000x10xf32>, vector<8x10xf32> -> vector<8x10xf32>
    %c0_3 = arith.constant 0 : index
    %c0_4 = arith.constant 0 : index
    %3 = vector.load %arg3[%c0_3, %c0_4] : memref<1x10xf32, #tpu.memory_space<vmem>>, vector<1x10xf32>
    %4 = vector.broadcast %3 : vector<1x10xf32> to vector<8x10xf32>
    %5 = arith.addf %2, %4 : vector<8x10xf32>
    %c0_5 = arith.constant 0 : index
    %c0_6 = arith.constant 0 : index
    %6 = vector.load %arg4[%c0_5, %c0_6] : memref<8x10xf32, #tpu.memory_space<vmem>>, vector<8x10xf32>
    tpu.vector_store %arg4[%c0_5, %c0_6], %5 {strides = array<i32>} : memref<8x10xf32, #tpu.memory_space<vmem>>, vector<8x10xf32>,
    return
  }
  func.func @transform_0(%arg0: i32) -> (i32, i32) {
    %c0_i32 = arith.constant 0 : i32
    %c0_i32_0 = arith.constant 0 : i32
    return %arg0, %c0_i32 : i32, i32
  }
  func.func @transform_1(%arg0: i32) -> (i32, i32) {
    %c0_i32 = arith.constant 0 : i32
    %c0_i32_0 = arith.constant 0 : i32
    %c0_i32_1 = arith.constant 0 : i32
    return %c0_i32, %c0_i32_0 : i32, i32
  }
  func.func @transform_2(%arg0: i32) -> (i32, i32) {
    %c0_i32 = arith.constant 0 : i32
    %c0_i32_0 = arith.constant 0 : i32
    %c0_i32_1 = arith.constant 0 : i32
    return %c0_i32, %c0_i32_0 : i32, i32
  }
  func.func @transform_3(%arg0: i32) -> (i32, i32) {
    %c0_i32 = arith.constant 0 : i32
    %c0_i32_0 = arith.constant 0 : i32
    return %arg0, %c0_i32 : i32, i32
  }
}

</mosaic_0001>

<bundles_post_ra>
// kernel: baseline_forward.1
= control target key start
LH: loop header
LB: loop body
LE: loop exit
PB: predicated region body
PF: predicated region fallthrough
CT: control target
= control target key end

     0   :  { %s1042_s0 = inlined_call_operand.vmem [shape: f32[8,1000], index: 0, kind: input, shape index: {}]   ;;  %s1043_s1 = inlined_call_operand.vmem [shape: f32[1000,10], index: 1, kind: input, shape index: {}]   ;;  %s1044_s2 = inlined_call_operand.vmem [shape: f32[1,10], index: 2, kind: input, shape index: {}]   ;;  %s1045_s3 = inlined_call_operand.hbm [shape: f32[8,10], index: 3, kind: output, shape index: {}]  }
   0x1   :  { %v54_v0 = vld [vmem:[%s1043_s1 + $0xf8] sm:$0xff]  ;;  %v53_v4 = vld [vmem:[%s1043_s1 + $0xf0] sm:$0xff]  ;;  %v52_v8 = vld [vmem:[%s1043_s1 + $0xe8] sm:$0xff] }
   0x2   :  { %v86_v1 = vld [vmem:[%s1043_s1 + $0x1f8] sm:$0xff]  ;;  %457 = vmatprep.subr.mxu0 %v54_v0  ;;  %v85_v5 = vld [vmem:[%s1043_s1 + $0x1f0] sm:$0xff]  ;;  %v84_v9 = vld [vmem:[%s1043_s1 + $0x1e8] sm:$0xff] }
   0x3   :  { %v38_v2 = vld [vmem:[%s1043_s1 + $0x78] sm:$0xff]  ;;  %492 = vmatprep.subr.mxu1 %v86_v1  ;;  %v37_v6 = vld [vmem:[%s1043_s1 + $0x70] sm:$0xff]  ;;  %v36_v10 = vld [vmem:[%s1043_s1 + $0x68] sm:$0xff] }
   0x4   :  { %v70_v3 = vld [vmem:[%s1043_s1 + $0x178] sm:$0xff]  ;;  %458 = vmatpush3.msra.mxu0 %v38_v2  ;;  %v69_v7 = vld [vmem:[%s1043_s1 + $0x170] sm:$0xff]  ;;  %v68_v11 = vld [vmem:[%s1043_s1 + $0x168] sm:$0xff] }
   0x5   :  { %493 = vmatpush3.msra.mxu1 %v70_v3  ;;  %459 = vmatprep.subr.mxu0 %v53_v4  ;;  %v51_v12 = vld [vmem:[%s1043_s1 + $0xe0] sm:$0xff]  ;;  %v50_v16 = vld [vmem:[%s1043_s1 + $0xd8] sm:$0xff]  ;;  %v49_v20 = vld [vmem:[%s1043_s1 + $0xd0] sm:$0xff] }
   0x6   :  { %494 = vmatprep.subr.mxu1 %v85_v5  ;;  %460 = vmatpush3.msra.mxu0 %v37_v6  ;;  %v83_v13 = vld [vmem:[%s1043_s1 + $0x1e0] sm:$0xff]  ;;  %v82_v17 = vld [vmem:[%s1043_s1 + $0x1d8] sm:$0xff]  ;;  %v81_v21 = vld [vmem:[%s1043_s1 + $0x1d0] sm:$0xff] }
   0x7   :  { %495 = vmatpush3.msra.mxu1 %v69_v7  ;;  %461 = vmatprep.subr.mxu0 %v52_v8  ;;  %v35_v14 = vld [vmem:[%s1043_s1 + $0x60] sm:$0xff]  ;;  %v34_v18 = vld [vmem:[%s1043_s1 + $0x58] sm:$0xff]  ;;  %v33_v22 = vld [vmem:[%s1043_s1 + $0x50] sm:$0xff]  ;;  %v586_v8 = vmov 0.0  }
   0x8   :  { %496 = vmatprep.subr.mxu1 %v84_v9  ;;  %v67_v15 = vld [vmem:[%s1043_s1 + $0x160] sm:$0xff]  ;;  %462 = vmatpush3.msra.mxu0 %v36_v10  ;;  %v66_v19 = vld [vmem:[%s1043_s1 + $0x158] sm:$0xff]  ;;  %v65_v23 = vld [vmem:[%s1043_s1 + $0x150] sm:$0xff] }
   0x9   :  { %497 = vmatpush3.msra.mxu1 %v68_v11  ;;  %463 = vmatprep.subr.mxu0 %v51_v12  ;;  %v48_v24 = vld [vmem:[%s1043_s1 + $0xc8] sm:$0xff]  ;;  %v47_v28 = vld [vmem:[%s1043_s1 + $0xc0] sm:$0xff]  ;;  %v46_v32 = vld [vmem:[%s1043_s1 + $0xb8] sm:$0xff] }
   0xa   :  { %498 = vmatprep.subr.mxu1 %v83_v13  ;;  %464 = vmatpush3.msra.mxu0 %v35_v14  ;;  %v80_v25 = vld [vmem:[%s1043_s1 + $0x1c8] sm:$0xff]  ;;  %v79_v29 = vld [vmem:[%s1043_s1 + $0x1c0] sm:$0xff]  ;;  %v78_v33 = vld [vmem:[%s1043_s1 + $0x1b8] sm:$0xff] }
   0xb   :  { %499 = vmatpush3.msra.mxu1 %v67_v15  ;;  %465 = vmatprep.subr.mxu0 %v50_v16  ;;  %v32_v26 = vld [vmem:[%s1043_s1 + $0x48] sm:$0xff]  ;;  %v31_v30 = vld [vmem:[%s1043_s1 + $0x40] sm:$0xff]  ;;  %v30_v34 = vld [vmem:[%s1043_s1 + $0x38] sm:$0xff] }
   0xc   :  { %500 = vmatprep.subr.mxu1 %v82_v17  ;;  %466 = vmatpush3.msra.mxu0 %v34_v18  ;;  %v64_v27 = vld [vmem:[%s1043_s1 + $0x148] sm:$0xff]  ;;  %v63_v31 = vld [vmem:[%s1043_s1 + $0x140] sm:$0xff]  ;;  %v62_v35 = vld [vmem:[%s1043_s1 + $0x138] sm:$0xff] }
   0xd   :  { %501 = vmatpush3.msra.mxu1 %v66_v19  ;;  %467 = vmatprep.subr.mxu0 %v49_v20  ;;  %v45_v36 = vld [vmem:[%s1043_s1 + $0xb0] sm:$0xff]  ;;  %v44_v40 = vld [vmem:[%s1043_s1 + $0xa8] sm:$0xff]  ;;  %v43_v44 = vld [vmem:[%s1043_s1 + $0xa0] sm:$0xff] }
   0xe   :  { %502 = vmatprep.subr.mxu1 %v81_v21  ;;  %468 = vmatpush3.msra.mxu0 %v33_v22  ;;  %v77_v37 = vld [vmem:[%s1043_s1 + $0x1b0] sm:$0xff]  ;;  %v76_v41 = vld [vmem:[%s1043_s1 + $0x1a8] sm:$0xff]  ;;  %v75_v45 = vld [vmem:[%s1043_s1 + $0x1a0] sm:$0xff] }
   0xf   :  { %503 = vmatpush3.msra.mxu1 %v65_v23  ;;  %469 = vmatprep.subr.mxu0 %v48_v24  ;;  %v29_v38 = vld [vmem:[%s1043_s1 + $0x30] sm:$0xff]  ;;  %v28_v42 = vld [vmem:[%s1043_s1 + $0x28] sm:$0xff]  ;;  %v27_v46 = vld [vmem:[%s1043_s1 + $0x20] sm:$0xff] }
  0x10   :  { %504 = vmatprep.subr.mxu1 %v80_v25  ;;  %470 = vmatpush3.msra.mxu0 %v32_v26  ;;  %v61_v39 = vld [vmem:[%s1043_s1 + $0x130] sm:$0xff]  ;;  %v60_v43 = vld [vmem:[%s1043_s1 + $0x128] sm:$0xff]  ;;  %v59_v47 = vld [vmem:[%s1043_s1 + $0x120] sm:$0xff] }
  0x11   :  { %505 = vmatpush3.msra.mxu1 %v64_v27  ;;  %471 = vmatprep.subr.mxu0 %v47_v28  ;;  %v42_v48 = vld [vmem:[%s1043_s1 + $0x98] sm:$0xff]  ;;  %v41_v52 = vld [vmem:[%s1043_s1 + $0x90] sm:$0xff]  ;;  %v40_v56 = vld [vmem:[%s1043_s1 + $0x88] sm:$0xff] }
  0x12   :  { %506 = vmatprep.subr.mxu1 %v79_v29  ;;  %472 = vmatpush3.msra.mxu0 %v31_v30  ;;  %v74_v49 = vld [vmem:[%s1043_s1 + $0x198] sm:$0xff]  ;;  %v73_v53 = vld [vmem:[%s1043_s1 + $0x190] sm:$0xff]  ;;  %v72_v57 = vld [vmem:[%s1043_s1 + $0x188] sm:$0xff] }
  0x13   :  { %507 = vmatpush3.msra.mxu1 %v63_v31  ;;  %473 = vmatprep.subr.mxu0 %v46_v32  ;;  %v26_v50 = vld [vmem:[%s1043_s1 + $0x18] sm:$0xff]  ;;  %v25_v54 = vld [vmem:[%s1043_s1 + $0x10] sm:$0xff]  ;;  %v24_v58 = vld [vmem:[%s1043_s1 + $0x8] sm:$0xff] }
  0x14   :  { %508 = vmatprep.subr.mxu1 %v78_v33  ;;  %474 = vmatpush3.msra.mxu0 %v30_v34  ;;  %v58_v51 = vld [vmem:[%s1043_s1 + $0x118] sm:$0xff]  ;;  %v57_v55 = vld [vmem:[%s1043_s1 + $0x110] sm:$0xff]  ;;  %v56_v59 = vld [vmem:[%s1043_s1 + $0x108] sm:$0xff] }
  0x15   :  { %509 = vmatpush3.msra.mxu1 %v62_v35  ;;  %475 = vmatprep.subr.mxu0 %v45_v36  ;;  %v39_v60 = vld [vmem:[%s1043_s1 + $0x80] sm:$0xff]  ;;  %v16_v63 = vld [vmem:[%s1042_s0 + $0x8] sm:$0xff]  ;;  %v18_v1 = vld [vmem:[%s1042_s0 + $0x18] sm:$0xff] }
  0x16   :  { %510 = vmatprep.subr.mxu1 %v77_v37  ;;  %476 = vmatpush3.msra.mxu0 %v29_v38  ;;  %v71_v61 = vld [vmem:[%s1043_s1 + $0x180] sm:$0xff]  ;;  %v17_v3 = vld [vmem:[%s1042_s0 + $0x10] sm:$0xff]  ;;  %v118_v4 = vld [vmem:[%s1043_s1 + $0x2f8] sm:$0xff] }
  0x17   :  { %511 = vmatpush3.msra.mxu1 %v61_v39  ;;  %477 = vmatprep.subr.mxu0 %v44_v40  ;;  %v23_v62 = vld [vmem:[%s1043_s1] sm:$0xff]  ;;  %v102_v5 = vld [vmem:[%s1043_s1 + $0x278] sm:$0xff]  ;;  %v117_v7 = vld [vmem:[%s1043_s1 + $0x2f0] sm:$0xff] }
  0x18   :  { %512 = vmatprep.subr.mxu1 %v76_v41  ;;  %478 = vmatpush3.msra.mxu0 %v28_v42  ;;  %v55_v0 = vld [vmem:[%s1043_s1 + $0x100] sm:$0xff]  ;;  %v134_v6 = vld [vmem:[%s1043_s1 + $0x378] sm:$0xff]  ;;  %v101_v9 = vld [vmem:[%s1043_s1 + $0x270] sm:$0xff] }
  0x19   :  { %513 = vmatpush3.msra.mxu1 %v60_v43  ;;  %479 = vmatprep.subr.mxu0 %v43_v44  ;;  %v15_v2 = vld [vmem:[%s1042_s0] sm:$0xff]  ;;  %v133_v10 = vld [vmem:[%s1043_s1 + $0x370] sm:$0xff]  ;;  %v116_v11 = vld [vmem:[%s1043_s1 + $0x2e8] sm:$0xff] }
  0x1a   :  { %514 = vmatprep.subr.mxu1 %v75_v45  ;;  %480 = vmatpush3.msra.mxu0 %v27_v46  ;;  %v100_v12 = vld [vmem:[%s1043_s1 + $0x268] sm:$0xff]  ;;  %v115_v14 = vld [vmem:[%s1043_s1 + $0x2e0] sm:$0xff]  ;;  %v114_v17 = vld [vmem:[%s1043_s1 + $0x2d8] sm:$0xff] }
  0x1b   :  { %515 = vmatpush3.msra.mxu1 %v59_v47  ;;  %481 = vmatprep.subr.mxu0 %v42_v48  ;;  %v132_v13 = vld [vmem:[%s1043_s1 + $0x368] sm:$0xff]  ;;  %v99_v15 = vld [vmem:[%s1043_s1 + $0x260] sm:$0xff]  ;;  %v98_v18 = vld [vmem:[%s1043_s1 + $0x258] sm:$0xff] }
  0x1c   :  { %516 = vmatprep.subr.mxu1 %v74_v49  ;;  %482 = vmatpush3.msra.mxu0 %v26_v50  ;;  %v131_v16 = vld [vmem:[%s1043_s1 + $0x360] sm:$0xff]  ;;  %v130_v19 = vld [vmem:[%s1043_s1 + $0x358] sm:$0xff]  ;;  %v113_v20 = vld [vmem:[%s1043_s1 + $0x2d0] sm:$0xff] }
  0x1d   :  { %517 = vmatpush3.msra.mxu1 %v58_v51  ;;  %483 = vmatprep.subr.mxu0 %v41_v52  ;;  %v97_v21 = vld [vmem:[%s1043_s1 + $0x250] sm:$0xff]  ;;  %v112_v23 = vld [vmem:[%s1043_s1 + $0x2c8] sm:$0xff] }
  0x1e   :  { %518 = vmatprep.subr.mxu1 %v73_v53  ;;  %484 = vmatpush3.msra.mxu0 %v25_v54  ;;  %v129_v22 = vld [vmem:[%s1043_s1 + $0x350] sm:$0xff] }
  0x1f   :  { %519 = vmatpush3.msra.mxu1 %v57_v55  ;;  %485 = vmatprep.subr.mxu0 %v40_v56 }
  0x20   :  { %520 = vmatprep.subr.mxu1 %v72_v57  ;;  %486 = vmatpush3.msra.mxu0 %v24_v58 }
  0x21   :  { %521 = vmatpush3.msra.mxu1 %v56_v59  ;;  %487 = vmatprep.subr.mxu0 %v39_v60 }
  0x22   :  { %522 = vmatprep.subr.mxu1 %v71_v61  ;;  %488 = vmatpush3.msra.mxu0 %v23_v62 }
  0x23   :  { %223 = vmatprep.mubr.f32.mxu0 %v16_v63  ;;  %523 = vmatpush3.msra.mxu1 %v55_v0 }
  0x24   :  { %293 = vmatprep.mubr.f32.mxu1 %v18_v1  ;;  %224 = vmatmul.mubr.f32.vlgmr.msra.gmra.mxu0 %v15_v2 }
  0x25   :  { %294 = vmatmul.mubr.f32.vlgmr.msra.gmra.mxu1 %v17_v3  ;;  %527 = vmatprep.subr.mxu0 %v118_v4 }
  0x26   :  { %369 = vmatprep.subr.mxu1 %v586_v8  ;;  %528 = vmatpush3.msra.mxu0 %v102_v5 }
  0x27   :  { %370 = vmatpush1.msra.mxu1 %v134_v6  ;;  %529 = vmatprep.subr.mxu0 %v117_v7 }
  0x28   :  { %371 = vmatprep.subr.mxu1 %v586_v8  ;;  %530 = vmatpush3.msra.mxu0 %v101_v9 }
  0x29   :  { %372 = vmatpush1.msra.mxu1 %v133_v10  ;;  %531 = vmatprep.subr.mxu0 %v116_v11 }
  0x2a   :  { %373 = vmatprep.subr.mxu1 %v586_v8  ;;  %532 = vmatpush3.msra.mxu0 %v100_v12 }
  0x2b   :  { %374 = vmatpush1.msra.mxu1 %v132_v13  ;;  %533 = vmatprep.subr.mxu0 %v115_v14 }
  0x2c   :  { %375 = vmatprep.subr.mxu1 %v586_v8  ;;  %534 = vmatpush3.msra.mxu0 %v99_v15 }
  0x2d   :  { %376 = vmatpush1.msra.mxu1 %v131_v16  ;;  %535 = vmatprep.subr.mxu0 %v114_v17 }
  0x2e   :  { %377 = vmatprep.subr.mxu1 %v586_v8  ;;  %536 = vmatpush3.msra.mxu0 %v98_v18 }
  0x2f   :  { %378 = vmatpush1.msra.mxu1 %v130_v19 }
  0x30   :  { %8 = vsyncpa [#allocation3], 0  ;;  %537 = vmatprep.subr.mxu0 %v113_v20  ;;  %379 = vmatprep.subr.mxu1 %v586_v8  ;;  %v96_v24 = vld [vmem:[%s1043_s1 + $0x248] sm:$0xff]  ;;  %v111_v26 = vld [vmem:[%s1043_s1 + $0x2c0] sm:$0xff]  ;;  %vm155_vm0 = vcmask 850944   ;;  %vm439_vm1 = vcmask 80896  }
  0x31   :  { %v128_v25 = vld [vmem:[%s1043_s1 + $0x348] sm:$0xff]  ;;  %538 = vmatpush3.msra.mxu0 %v97_v21  ;;  %380 = vmatpush1.msra.mxu1 %v129_v22  ;;  %v95_v27 = vld [vmem:[%s1043_s1 + $0x240] sm:$0xff]  ;;  %v110_v29 = vld [vmem:[%s1043_s1 + $0x2b8] sm:$0xff] }
  0x32   :  { %539 = vmatprep.subr.mxu0 %v112_v23  ;;  %381 = vmatprep.subr.mxu1 %v586_v8  ;;  %v127_v28 = vld [vmem:[%s1043_s1 + $0x340] sm:$0xff]  ;;  %v94_v30 = vld [vmem:[%s1043_s1 + $0x238] sm:$0xff]  ;;  %v109_v32 = vld [vmem:[%s1043_s1 + $0x2b0] sm:$0xff] }
  0x33   :  { %540 = vmatpush3.msra.mxu0 %v96_v24  ;;  %382 = vmatpush1.msra.mxu1 %v128_v25  ;;  %v126_v31 = vld [vmem:[%s1043_s1 + $0x338] sm:$0xff]  ;;  %v93_v33 = vld [vmem:[%s1043_s1 + $0x230] sm:$0xff]  ;;  %v108_v35 = vld [vmem:[%s1043_s1 + $0x2a8] sm:$0xff] }
  0x34   :  { %541 = vmatprep.subr.mxu0 %v111_v26  ;;  %383 = vmatprep.subr.mxu1 %v586_v8  ;;  %v125_v34 = vld [vmem:[%s1043_s1 + $0x330] sm:$0xff]  ;;  %v92_v36 = vld [vmem:[%s1043_s1 + $0x228] sm:$0xff]  ;;  %v107_v38 = vld [vmem:[%s1043_s1 + $0x2a0] sm:$0xff] }
  0x35   :  { %542 = vmatpush3.msra.mxu0 %v95_v27  ;;  %384 = vmatpush1.msra.mxu1 %v127_v28  ;;  %v124_v37 = vld [vmem:[%s1043_s1 + $0x328] sm:$0xff]  ;;  %v91_v39 = vld [vmem:[%s1043_s1 + $0x220] sm:$0xff]  ;;  %v106_v41 = vld [vmem:[%s1043_s1 + $0x298] sm:$0xff] }
  0x36   :  { %543 = vmatprep.subr.mxu0 %v110_v29  ;;  %385 = vmatprep.subr.mxu1 %v586_v8  ;;  %v123_v40 = vld [vmem:[%s1043_s1 + $0x320] sm:$0xff]  ;;  %v90_v42 = vld [vmem:[%s1043_s1 + $0x218] sm:$0xff]  ;;  %v105_v44 = vld [vmem:[%s1043_s1 + $0x290] sm:$0xff] }
  0x37   :  { %544 = vmatpush3.msra.mxu0 %v94_v30  ;;  %386 = vmatpush1.msra.mxu1 %v126_v31  ;;  %v122_v43 = vld [vmem:[%s1043_s1 + $0x318] sm:$0xff]  ;;  %v89_v45 = vld [vmem:[%s1043_s1 + $0x210] sm:$0xff]  ;;  %v104_v47 = vld [vmem:[%s1043_s1 + $0x288] sm:$0xff] }
  0x38   :  { %545 = vmatprep.subr.mxu0 %v109_v32  ;;  %387 = vmatprep.subr.mxu1 %v586_v8  ;;  %v121_v46 = vld [vmem:[%s1043_s1 + $0x310] sm:$0xff]  ;;  %v88_v48 = vld [vmem:[%s1043_s1 + $0x208] sm:$0xff]  ;;  %v103_v50 = vld [vmem:[%s1043_s1 + $0x280] sm:$0xff] }
  0x39   :  { %546 = vmatpush3.msra.mxu0 %v93_v33  ;;  %388 = vmatpush1.msra.mxu1 %v125_v34  ;;  %v120_v49 = vld [vmem:[%s1043_s1 + $0x308] sm:$0xff]  ;;  %v87_v51 = vld [vmem:[%s1043_s1 + $0x200] sm:$0xff]  ;;  %v22_v55 = vld [vmem:[%s1042_s0 + $0x38] sm:$0xff] }
  0x3a   :  { %547 = vmatprep.subr.mxu0 %v108_v35  ;;  %389 = vmatprep.subr.mxu1 %v586_v8  ;;  %v20_v52 = vld [vmem:[%s1042_s0 + $0x28] sm:$0xff]  ;;  %v119_v53 = vld [vmem:[%s1043_s1 + $0x300] sm:$0xff]  ;;  %v146_v57 = vld [vmem:[%s1043_s1 + $0x3d8] sm:$0xff] }
  0x3b   :  { %548 = vmatpush3.msra.mxu0 %v92_v36  ;;  %390 = vmatpush1.msra.mxu1 %v124_v37  ;;  %v19_v54 = vld [vmem:[%s1042_s0 + $0x20] sm:$0xff]  ;;  %v145_v58 = vld [vmem:[%s1043_s1 + $0x3d0] sm:$0xff]  ;;  %v144_v59 = vld [vmem:[%s1043_s1 + $0x3c8] sm:$0xff] }
  0x3c   :  { %549 = vmatprep.subr.mxu0 %v107_v38  ;;  %391 = vmatprep.subr.mxu1 %v586_v8  ;;  %v147_v56 = vld [vmem:[%s1043_s1 + $0x3e0] sm:$0xff]  ;;  %v142_v61 = vld [vmem:[%s1043_s1 + $0x3b8] sm:$0xff]  ;;  %v141_v62 = vld [vmem:[%s1043_s1 + $0x3b0] sm:$0xff] }
  0x3d   :  { %550 = vmatpush3.msra.mxu0 %v91_v39  ;;  %392 = vmatpush1.msra.mxu1 %v123_v40  ;;  %v143_v60 = vld [vmem:[%s1043_s1 + $0x3c0] sm:$0xff]  ;;  %v140_v63 = vld [vmem:[%s1043_s1 + $0x3a8] sm:$0xff]  ;;  %v138_v1 = vld [vmem:[%s1043_s1 + $0x398] sm:$0xff] }
  0x3e   :  { %551 = vmatprep.subr.mxu0 %v106_v41  ;;  %393 = vmatprep.subr.mxu1 %v586_v8  ;;  %v139_v0 = vld [vmem:[%s1043_s1 + $0x3a0] sm:$0xff]  ;;  %v137_v2 = vld [vmem:[%s1043_s1 + $0x390] sm:$0xff]  ;;  %v136_v3 = vld [vmem:[%s1043_s1 + $0x388] sm:$0xff] }
  0x3f   :  { %552 = vmatpush3.msra.mxu0 %v90_v42  ;;  %394 = vmatpush1.msra.mxu1 %v122_v43  ;;  %v135_v4 = vld [vmem:[%s1043_s1 + $0x380] sm:$0xff]  ;;  %v21_v5 = vld [vmem:[%s1042_s0 + $0x30] sm:$0xff]  ;;  %s587_s0 = smov [#allocation2]  }
  0x40   :  { %553 = vmatprep.subr.mxu0 %v105_v44  ;;  %395 = vmatprep.subr.mxu1 %v586_v8  ;;  %v455_v12 = vld [vmem:[%s1044_s2] ss:$0 sm:$0xff]  ;;  %s447_s1 = sshll.u32 %s587_s0, 4  ;;  %s448_s1 = int_to_ptr.vmem [resolvable:$true] %s447_s1 }
  0x41   :  { %554 = vmatpush3.msra.mxu0 %v89_v45  ;;  %396 = vmatpush1.msra.mxu1 %v121_v46  ;;  %s564_s10 = scalar_lea.vmem %s448_s1, 128  ;;  %p569_p1 = scmp.lt.s32.totalorder %s448_s1, %s448_s1 }
  0x42   :  { %555 = vmatprep.subr.mxu0 %v104_v47  ;;  %397 = vmatprep.subr.mxu1 %v586_v8  ;;  %p565_p0 = scmp.ne.s32.totalorder %s448_s1, %s564_s10  ;;  %p570_p2 = scmp.lt.s32.totalorder %s564_s10, %s564_s10 }
  0x43   :  { %556 = vmatpush3.msra.mxu0 %v88_v48  ;;  %398 = vmatpush1.msra.mxu1 %v120_v49 }
  0x44   :  { %557 = vmatprep.subr.mxu0 %v103_v50  ;;  %399 = vmatprep.subr.mxu1 %v586_v8  ;;  %p571_p3 = por %p570_p2, %p569_p1 }
  0x45   :  { %558 = vmatpush3.msra.mxu0 %v87_v51  ;;  %363 = vmatprep.mubr.f32.mxu0 %v20_v52 }
  0x46   :  { %400 = vmatpush1.msra.mxu1 %v119_v53  ;;  %364 = vmatmul.mubr.f32.vlgmr.msra.gmra.mxu0 %v19_v54  ;;  %p572_p4 = pnand %p571_p3, %p565_p0 }
  0x47   :  { %407 = vmatprep.subr.mxu1 %v586_v8  ;;  %456 = vmatprep.mubr.msk.f32.mxu1 %vm155_vm0, %v22_v55 }
  0x48   :  { %408 = vmatpush2.msra.mxu1 %v147_v56 }
  0x49   :  { %409 = vmatprep.subr.mxu1 %v586_v8 }
  0x4a   :  { %410 = vmatpush2.msra.mxu1 %v146_v57 }
  0x4b   :  { %411 = vmatprep.subr.mxu1 %v586_v8 }
  0x4c   :  { %412 = vmatpush2.msra.mxu1 %v145_v58 }
  0x4d   :  { %413 = vmatprep.subr.mxu1 %v586_v8 }
  0x4e   :  { %414 = vmatpush2.msra.mxu1 %v144_v59 }
  0x4f   :  { %415 = vmatprep.subr.mxu1 %v586_v8 }
  0x50   :  { %416 = vmatpush2.msra.mxu1 %v143_v60 }
  0x51   :  { %417 = vmatprep.subr.mxu1 %v586_v8 }
  0x52   :  { %418 = vmatpush2.msra.mxu1 %v142_v61 }
  0x53   :  { %419 = vmatprep.subr.mxu1 %v586_v8 }
  0x54   :  { %420 = vmatpush2.msra.mxu1 %v141_v62 }
  0x55   :  { %421 = vmatprep.subr.mxu1 %v586_v8 }
  0x56   :  { %422 = vmatpush2.msra.mxu1 %v140_v63 }
  0x57   :  { %423 = vmatprep.subr.mxu1 %v586_v8 }
  0x58   :  { %424 = vmatpush2.msra.mxu1 %v139_v0 }
  0x59   :  { %425 = vmatprep.subr.mxu1 %v586_v8 }
  0x5a   :  { %426 = vmatpush2.msra.mxu1 %v138_v1 }
  0x5b   :  { %427 = vmatprep.subr.mxu1 %v586_v8 }
  0x5c   :  { %428 = vmatpush2.msra.mxu1 %v137_v2 }
  0x5d   :  { %429 = vmatprep.subr.mxu1 %v586_v8 }
  0x5e   :  { %430 = vmatpush2.msra.mxu1 %v136_v3 }
  0x5f   :  { %431 = vmatprep.subr.mxu1 %v586_v8 }
  0x60   :  { %432 = vmatpush2.msra.mxu1 %v135_v4 }
  0x61   :  { %434 = vmatmul.mubr.f32.vlgmr.msra.gmra.mxu1 %v21_v5 }
  0xe4   :  { %v489_v6 = vpop.f32.mrf.mxu0 }
  0xe5   :  { %v524_v9 = vpop.f32.mrf.mxu1 }
  0xe6   :  { %v490_v7 = vpop.f32.mrf.mxu0 }
  0xe7   :  { %v491_v11 = vadd.f32 %v490_v7, %v489_v6  ;;  %v525_v13 = vpop.f32.mrf.mxu1 }
  0xe8   :  { %v526_v16 = vadd.f32 %v525_v13, %v524_v9 }
  0xe9   :  { %v226_v15 = vadd.f32 %v491_v11, %v455_v12 }
  0xeb   :  { %v296_v18 = vadd.f32 %v526_v16, %v226_v15 }
 0x106   :  { %v559_v10 = vpop.f32.mrf.mxu0 }
 0x108   :  { %v560_v14 = vpop.f32.mrf.mxu0 }
 0x109   :  { %v561_v17 = vadd.f32 %v560_v14, %v559_v10 }
 0x10b   :  { %v366_v8 = vadd.f32 %v561_v17, %v296_v18 }
 0x121   :  { %v435_v19 = vpop.f32.mrf.mxu1 }
 0x122   :  { %v436_v20 = vadd.f32 %v435_v19, %v366_v8 }
 0x123   :  { %v437_v21 = vpop.f32.mrf.mxu1 }
 0x124   :  { %440 = vst.msk [vmem:[#allocation2] sm:$0xff] %vm439_vm1, %v436_v20 }
 0x125   :  { %575 = shalt.err (!%p572_p4)
}
 0x126   :  { %450 = dma.vmem_to_hbm [thread:$0]  %s448_s1, 128, %s1045_s3, [#allocation3]  }
 0x127   :  { %584 = dma.done.wait [#allocation3], 128  }
 0x128   :  { %585 = vsyncadd [#allocation3], 4294967168 }
 0x129   :  { %454 = vsyncpa [#allocation3], 1 }

</bundles_post_ra>
